<compile_context>
chip_gen: v5e
topology: v5e:2x2
jax: 0.10.0
libtpu: 0.0.40
codegen_flags: <defaults>
</compile_context>

<pallas_src>
from functools import partial

import jax
import jax.numpy as jnp
from jax.experimental import pallas as pl
from jax.experimental.pallas import tpu as pltpu

LRELU_SLOPE = 0.1
EPS = 1e-5  # PyTorch InstanceNorm2d default


def _round_up(x, m):
    return ((x + m - 1) // m) * m


def residual_block_kernel(x_ref, mask_ref, w1_ref, g1_ref, b1_ref,
                          w2_ref, g2_ref, b2_ref, out_ref, y1e_ref,
                          *, H, W, Pc, S):
    """One batch element per grid step.

    x_ref   : (1, Cin_p, Pe)   zero-extended padded-flat input, bf16
    mask_ref: (1, Pc)          1.0 at interior pixels of the padded-flat image
    w*_ref  : (Cout_p, 9*C)    bf16 conv weights, tap-major contraction layout
    g*/b*   : (Cout_p, 1)      InstanceNorm affine params, f32
    out_ref : (1, Cout_p, Pc)  padded-flat output (lane-dense), f32
    y1e_ref : (Cout_p, Pe)     bf16 VMEM scratch staging branch-1 output
    """
    Hp, Wp = H + 2, W + 2
    P = Hp * Wp
    o0 = Wp + 1                       # halo width on the flat axis
    inv_count = 1.0 / float(H * W)
    C2 = y1e_ref.shape[0]

    # Static tap offsets into the extended flat axis (row-major, dy then dx).
    offs = [S + (dy - 1) * Wp + (dx - 1) for dy in range(3) for dx in range(3)]

    mask = mask_ref[...]              # (1, Pc) f32

    def conv(tap_fn, w_bf16):
        # im2col: one lane-dense matmul instead of 9 tiny K=C matmuls.
        taps = jnp.concatenate([tap_fn(o) for o in offs], axis=0)   # (9*C, Pc) bf16
        return jnp.dot(w_bf16, taps,
                       preferred_element_type=jnp.float32)          # (Cout_p, Pc) f32

    def inorm_lrelu(y, gamma, beta, zero_border):
        # Single-pass masked statistics over the H*W interior pixels.
        y_m = y * mask
        mean = jnp.sum(y_m, axis=1, keepdims=True) * inv_count       # (C, 1)
        msq = jnp.sum(y_m * y, axis=1, keepdims=True) * inv_count    # (C, 1)
        var = jnp.maximum(msq - mean * mean, 0.0)
        # Fused affine: one mul + one add per element.
        scale = gamma * jax.lax.rsqrt(var + EPS)
        shift = beta - mean * scale
        yn = y * scale + shift
        act = jnp.maximum(yn, LRELU_SLOPE * yn)                      # LeakyReLU(0.1)
        # Zero the border only when it is consumed downstream (branch 1 feeds
        # conv2 and needs zero padding); branch 2's border is sliced off later.
        return act * mask if zero_border else act

    x = x_ref[0]                                                     # (Cin_p, Pe) bf16

    # ---- conv1 -> IN -> LeakyReLU -------------------------------------------
    y1 = conv(lambda o: x[:, o:o + Pc], w1_ref[...])
    y1 = inorm_lrelu(y1, g1_ref[...], b1_ref[...], zero_border=True)

    # Stage y1 into the extended scratch.  Only the o0-wide halo strips on each
    # side of the interior are re-zeroed (they are read by conv2's taps but
    # never written); doing it every step keeps the kernel correct even when
    # the grid is sharded across TensorCores.
    y1e_ref[:, pl.ds(S - o0, o0)] = jnp.zeros((C2, o0), y1e_ref.dtype)
    y1e_ref[:, pl.ds(S + Pc, o0)] = jnp.zeros((C2, o0), y1e_ref.dtype)
    y1e_ref[:, pl.ds(S, Pc)] = y1.astype(y1e_ref.dtype)              # lane-aligned store

    # ---- conv2 -> IN -> LeakyReLU -------------------------------------------
    y2 = conv(lambda o: y1e_ref[:, pl.ds(o, Pc)], w2_ref[...])
    y2 = inorm_lrelu(y2, g2_ref[...], b2_ref[...], zero_border=False)

    # ---- residual add: branch-1 output + branch-2 output ---------------------
    out_ref[0] = y1 + y2


def residual_block(x_nchw, w1, g1, b1, w2, g2, b2):
    """x_nchw: (N, Cin, H, W); w*: (Cout, Cin|Cout, 3, 3) OIHW; g*/b*: (Cout,)."""
    N, Cin, H, W = x_nchw.shape
    Cout = w1.shape[0]
    Hp, Wp = H + 2, W + 2
    P = Hp * Wp
    o0 = Wp + 1
    Pc = _round_up(P, 128)     # lane-dense conv N-dim / output width
    S = 128                    # lane-aligned start of the interior in extended buffers
    assert S >= o0, "image too wide for fixed halo start (needs W+3 <= 128)"
    Pe = S + Pc + o0           # extended flat length (front halo + interior + back halo)

    # Pad channel counts to multiples of 8 so sublane slices/concats are aligned.
    Cin_p = _round_up(Cin, 8)
    Cout_p = _round_up(Cout, 8)

    # ---- plain-JAX layout plumbing ------------------------------------------
    # input: pad channels, zero-pad spatially, flatten, extend flat axis, bf16.
    x_p = jnp.pad(x_nchw, ((0, 0), (0, Cin_p - Cin), (1, 1), (1, 1)))
    x_flat = x_p.reshape(N, Cin_p, P)
    x_ext = jnp.pad(x_flat, ((0, 0), (0, 0), (S, Pe - S - P))).astype(jnp.bfloat16)

    # interior mask over padded-flat positions (hoisted out of the kernel).
    rr = jnp.arange(Hp)
    cc = jnp.arange(Wp)
    m2 = ((rr >= 1) & (rr <= H))[:, None] & ((cc >= 1) & (cc <= W))[None, :]
    mask = jnp.pad(m2.astype(jnp.float32).reshape(1, P), ((0, 0), (0, Pc - P)))

    def prep_w(w, cin, cin_p):
        # OIHW -> (Cout_p, 9*cin_p), tap-major K ordering, bf16 MXU operands.
        wt = jnp.transpose(w, (0, 2, 3, 1))                  # (Cout, 3, 3, cin)
        wt = jnp.pad(wt, ((0, Cout_p - Cout), (0, 0), (0, 0), (0, cin_p - cin)))
        return wt.reshape(Cout_p, 9 * cin_p).astype(jnp.bfloat16)

    w1_k = prep_w(w1, Cin, Cin_p)
    w2_k = prep_w(w2, Cout, Cout_p)
    g1_k = jnp.pad(g1, (0, Cout_p - Cout)).reshape(Cout_p, 1)
    b1_k = jnp.pad(b1, (0, Cout_p - Cout)).reshape(Cout_p, 1)
    g2_k = jnp.pad(g2, (0, Cout_p - Cout)).reshape(Cout_p, 1)
    b2_k = jnp.pad(b2, (0, Cout_p - Cout)).reshape(Cout_p, 1)

    kernel = partial(residual_block_kernel, H=H, W=W, Pc=Pc, S=S)

    out_flat = pl.pallas_call(
        kernel,
        out_shape=jax.ShapeDtypeStruct((N, Cout_p, Pc), jnp.float32),
        grid_spec=pltpu.PrefetchScalarGridSpec(
            num_scalar_prefetch=0,
            grid=(N,),
            in_specs=[
                pl.BlockSpec((1, Cin_p, Pe), lambda n: (n, 0, 0)),
                pl.BlockSpec((1, Pc), lambda n: (0, 0)),
                pl.BlockSpec((Cout_p, 9 * Cin_p), lambda n: (0, 0)),
                pl.BlockSpec((Cout_p, 1), lambda n: (0, 0)),
                pl.BlockSpec((Cout_p, 1), lambda n: (0, 0)),
                pl.BlockSpec((Cout_p, 9 * Cout_p), lambda n: (0, 0)),
                pl.BlockSpec((Cout_p, 1), lambda n: (0, 0)),
                pl.BlockSpec((Cout_p, 1), lambda n: (0, 0)),
            ],
            out_specs=pl.BlockSpec((1, Cout_p, Pc), lambda n: (n, 0, 0)),
            scratch_shapes=[pltpu.VMEM((Cout_p, Pe), jnp.bfloat16)],
        ),
        # grid=(N,) keeps >= 2 steps so both v7x TensorCores get work.
        compiler_params=pltpu.CompilerParams(
            dimension_semantics=("parallel",)),
    )(x_ext, mask, w1_k, g1_k, b1_k, w2_k, g2_k, b2_k)

    # drop channel padding, dead lanes and the spatial border (already NCHW).
    out = out_flat[:, :Cout, :P].reshape(N, Cout, Hp, Wp)
    return out[:, :, 1:H + 1, 1:W + 1]


def ref_forward(x, w1, g1, b1, w2, g2, b2):
    """Pure-JAX f32 reference matching the PyTorch module semantics (NCHW)."""
    def conv(x, w):
        return jax.lax.conv_general_dilated(
            x, w, window_strides=(1, 1), padding=((1, 1), (1, 1)),
            dimension_numbers=("NCHW", "OIHW", "NCHW"))

    def inorm(x, g, b):
        mean = x.mean(axis=(2, 3), keepdims=True)
        var = ((x - mean) ** 2).mean(axis=(2, 3), keepdims=True)
        xn = (x - mean) / jnp.sqrt(var + EPS)
        return xn * g[None, :, None, None] + b[None, :, None, None]

    def lrelu(x):
        return jnp.where(x > 0, x, LRELU_SLOPE * x)

    y1 = lrelu(inorm(conv(x, w1), g1, b1))
    y2 = lrelu(inorm(conv(y1, w2), g2, b2))
    return y1 + y2


if __name__ == "__main__":
    N, Cin, Cout, H, W = 2, 4, 8, 16, 16
    key = jax.random.PRNGKey(0)
    ks = jax.random.split(key, 7)
    x = jax.random.normal(ks[0], (N, Cin, H, W), jnp.float32)
    w1 = 0.2 * jax.random.normal(ks[1], (Cout, Cin, 3, 3), jnp.float32)
    g1 = 1.0 + 0.1 * jax.random.normal(ks[2], (Cout,), jnp.float32)
    b1 = 0.1 * jax.random.normal(ks[3], (Cout,), jnp.float32)
    w2 = 0.2 * jax.random.normal(ks[4], (Cout, Cout, 3, 3), jnp.float32)
    g2 = 1.0 + 0.1 * jax.random.normal(ks[5], (Cout,), jnp.float32)
    b2 = 0.1 * jax.random.normal(ks[6], (Cout,), jnp.float32)

    out = jax.block_until_ready(residual_block(x, w1, g1, b1, w2, g2, b2))

    ref = ref_forward(x, w1, g1, b1, w2, g2, b2)
    assert out.shape == (N, Cout, H, W)
    max_err = float(jnp.max(jnp.abs(out - ref)))
    # bf16 matmul operands (f32 accumulation) -> loosened tolerance vs f32 ref.
    assert jnp.allclose(out, ref, atol=5e-2, rtol=5e-2), f"max_err={max_err}"
    print("KERNEL_OK")
</pallas_src>

<mosaic_0001>
module attributes {stable_mosaic.version = 11 : i64} {
  func.func @residual_block_kernel(%arg0: i32, %arg1: memref<1x8x531xbf16, #tpu.memory_space<vmem>>, %arg2: memref<1x384xf32, #tpu.memory_space<vmem>>, %arg3: memref<8x72xbf16, #tpu.memory_space<vmem>>, %arg4: memref<8x1xf32, #tpu.memory_space<vmem>>, %arg5: memref<8x1xf32, #tpu.memory_space<vmem>>, %arg6: memref<8x72xbf16, #tpu.memory_space<vmem>>, %arg7: memref<8x1xf32, #tpu.memory_space<vmem>>, %arg8: memref<8x1xf32, #tpu.memory_space<vmem>>, %arg9: memref<1x8x384xf32, #tpu.memory_space<vmem>>, %arg10: memref<8x531xbf16, #tpu.memory_space<vmem>>) attributes {dimension_semantics = [#tpu.dimension_semantics<parallel>], iteration_bounds = array<i64: 2>, scalar_prefetch = 0 : i64, scratch_operands = 1 : i64, tpu.core_type = #tpu.core_type<tc>, window_params = [{transform_indices = @transform_0, window_bounds = array<i64: 1, 8, 531>}, {pipeline_mode = #tpu.pipeline_mode<synchronous>, transform_indices = @transform_1, window_bounds = array<i64: 1, 384>}, {pipeline_mode = #tpu.pipeline_mode<synchronous>, transform_indices = @transform_2, window_bounds = array<i64: 8, 72>}, {pipeline_mode = #tpu.pipeline_mode<synchronous>, transform_indices = @transform_3, window_bounds = array<i64: 8, 1>}, {pipeline_mode = #tpu.pipeline_mode<synchronous>, transform_indices = @transform_4, window_bounds = array<i64: 8, 1>}, {pipeline_mode = #tpu.pipeline_mode<synchronous>, transform_indices = @transform_5, window_bounds = array<i64: 8, 72>}, {pipeline_mode = #tpu.pipeline_mode<synchronous>, transform_indices = @transform_6, window_bounds = array<i64: 8, 1>}, {pipeline_mode = #tpu.pipeline_mode<synchronous>, transform_indices = @transform_7, window_bounds = array<i64: 8, 1>}, {transform_indices = @transform_8, window_bounds = array<i64: 1, 8, 384>}]} {
    %c0 = arith.constant 0 : index
    %c0_0 = arith.constant 0 : index
    %0 = vector.load %arg2[%c0, %c0_0] : memref<1x384xf32, #tpu.memory_space<vmem>>, vector<1x384xf32>
    %c0_1 = arith.constant 0 : index
    %c0_2 = arith.constant 0 : index
    %c0_3 = arith.constant 0 : index
    %1 = vector.load %arg1[%c0_1, %c0_2, %c0_3] : memref<1x8x531xbf16, #tpu.memory_space<vmem>>, vector<1x8x531xbf16>
    %2 = vector.shape_cast %1 : vector<1x8x531xbf16> to vector<8x531xbf16>
    %c0_4 = arith.constant 0 : index
    %c0_5 = arith.constant 0 : index
    %3 = vector.load %arg3[%c0_4, %c0_5] : memref<8x72xbf16, #tpu.memory_space<vmem>>, vector<8x72xbf16>
    %4 = vector.extract_strided_slice %2 {offsets = [0, 109], sizes = [8, 384], strides = [1, 1]} : vector<8x531xbf16> to vector<8x384xbf16>
    %5 = vector.extract_strided_slice %2 {offsets = [0, 110], sizes = [8, 384], strides = [1, 1]} : vector<8x531xbf16> to vector<8x384xbf16>
    %6 = vector.extract_strided_slice %2 {offsets = [0, 111], sizes = [8, 384], strides = [1, 1]} : vector<8x531xbf16> to vector<8x384xbf16>
    %7 = vector.extract_strided_slice %2 {offsets = [0, 127], sizes = [8, 384], strides = [1, 1]} : vector<8x531xbf16> to vector<8x384xbf16>
    %8 = vector.extract_strided_slice %2 {offsets = [0, 128], sizes = [8, 384], strides = [1, 1]} : vector<8x531xbf16> to vector<8x384xbf16>
    %9 = vector.extract_strided_slice %2 {offsets = [0, 129], sizes = [8, 384], strides = [1, 1]} : vector<8x531xbf16> to vector<8x384xbf16>
    %10 = vector.extract_strided_slice %2 {offsets = [0, 145], sizes = [8, 384], strides = [1, 1]} : vector<8x531xbf16> to vector<8x384xbf16>
    %11 = vector.extract_strided_slice %2 {offsets = [0, 146], sizes = [8, 384], strides = [1, 1]} : vector<8x531xbf16> to vector<8x384xbf16>
    %12 = vector.extract_strided_slice %2 {offsets = [0, 147], sizes = [8, 384], strides = [1, 1]} : vector<8x531xbf16> to vector<8x384xbf16>
    %13 = tpu.concatenate %4, %5, %6, %7, %8, %9, %10, %11, %12 in 0 : vector<8x384xbf16>, vector<8x384xbf16>, vector<8x384xbf16>, vector<8x384xbf16>, vector<8x384xbf16>, vector<8x384xbf16>, vector<8x384xbf16>, vector<8x384xbf16>, vector<8x384xbf16> -> vector<72x384xbf16>
    %cst = arith.constant dense<0.000000e+00> : vector<8x384xf32>
    %14 = tpu.matmul %3, %13, %cst {dimension_numbers = #tpu.dot_dimension_numbers<[1], [0], [0], [1], [0, 0, 1, 1], [], []>} : vector<8x72xbf16>, vector<72x384xbf16>, vector<8x384xf32> -> vector<8x384xf32>
    %c0_6 = arith.constant 0 : index
    %c0_7 = arith.constant 0 : index
    %15 = vector.load %arg4[%c0_6, %c0_7] : memref<8x1xf32, #tpu.memory_space<vmem>>, vector<8x1xf32>
    %c0_8 = arith.constant 0 : index
    %c0_9 = arith.constant 0 : index
    %16 = vector.load %arg5[%c0_8, %c0_9] : memref<8x1xf32, #tpu.memory_space<vmem>>, vector<8x1xf32>
    %17 = vector.broadcast %0 : vector<1x384xf32> to vector<8x384xf32>
    %18 = arith.mulf %14, %17 : vector<8x384xf32>
    %cst_10 = arith.constant dense<0.000000e+00> : vector<8xf32>
    %19 = vector.multi_reduction <add>, %18, %cst_10 [1] : vector<8x384xf32> to vector<8xf32>
    %20 = vector.shape_cast %19 : vector<8xf32> to vector<8x1xf32>
    %cst_11 = arith.constant 3.906250e-03 : f32
    %21 = vector.broadcast %cst_11 : f32 to vector<8x1xf32>
    %22 = arith.mulf %20, %21 : vector<8x1xf32>
    %23 = arith.mulf %18, %14 : vector<8x384xf32>
    %cst_12 = arith.constant dense<0.000000e+00> : vector<8xf32>
    %24 = vector.multi_reduction <add>, %23, %cst_12 [1] : vector<8x384xf32> to vector<8xf32>
    %25 = vector.shape_cast %24 : vector<8xf32> to vector<8x1xf32>
    %cst_13 = arith.constant 3.906250e-03 : f32
    %26 = vector.broadcast %cst_13 : f32 to vector<8x1xf32>
    %27 = arith.mulf %25, %26 : vector<8x1xf32>
    %28 = arith.mulf %22, %22 : vector<8x1xf32>
    %29 = arith.subf %27, %28 : vector<8x1xf32>
    %cst_14 = arith.constant 0.000000e+00 : f32
    %30 = vector.broadcast %cst_14 : f32 to vector<8x1xf32>
    %31 = arith.maximumf %29, %30 : vector<8x1xf32>
    %cst_15 = arith.constant 9.99999974E-6 : f32
    %32 = vector.broadcast %cst_15 : f32 to vector<8x1xf32>
    %33 = arith.addf %31, %32 : vector<8x1xf32>
    %34 = math.rsqrt %33 : vector<8x1xf32>
    %35 = arith.mulf %15, %34 : vector<8x1xf32>
    %36 = arith.mulf %22, %35 : vector<8x1xf32>
    %37 = arith.subf %16, %36 : vector<8x1xf32>
    %38 = vector.broadcast %35 : vector<8x1xf32> to vector<8x384xf32>
    %39 = arith.mulf %14, %38 : vector<8x384xf32>
    %40 = vector.broadcast %37 : vector<8x1xf32> to vector<8x384xf32>
    %41 = arith.addf %39, %40 : vector<8x384xf32>
    %cst_16 = arith.constant 1.000000e-01 : f32
    %42 = vector.broadcast %cst_16 : f32 to vector<8x384xf32>
    %43 = arith.mulf %42, %41 : vector<8x384xf32>
    %44 = arith.maximumf %41, %43 : vector<8x384xf32>
    %45 = vector.broadcast %0 : vector<1x384xf32> to vector<8x384xf32>
    %46 = arith.mulf %44, %45 : vector<8x384xf32>
    %cst_17 = arith.constant 0.000000e+00 : bf16
    %47 = vector.broadcast %cst_17 : bf16 to vector<8x19xbf16>
    %c0_18 = arith.constant 0 : index
    %c109 = arith.constant 109 : index
    %48 = vector.load %arg10[%c0_18, %c109] : memref<8x531xbf16, #tpu.memory_space<vmem>>, vector<8x19xbf16>
    tpu.vector_store %arg10[%c0_18, %c109], %47 {strides = array<i32>} : memref<8x531xbf16, #tpu.memory_space<vmem>>, vector<8x19xbf16>,
    %cst_19 = arith.constant 0.000000e+00 : bf16
    %49 = vector.broadcast %cst_19 : bf16 to vector<8x19xbf16>
    %c0_20 = arith.constant 0 : index
    %c512 = arith.constant 512 : index
    %50 = vector.load %arg10[%c0_20, %c512] : memref<8x531xbf16, #tpu.memory_space<vmem>>, vector<8x19xbf16>
    tpu.vector_store %arg10[%c0_20, %c512], %49 {strides = array<i32>} : memref<8x531xbf16, #tpu.memory_space<vmem>>, vector<8x19xbf16>,
    %51 = arith.truncf %46 : vector<8x384xf32> to vector<8x384xbf16>
    %c0_21 = arith.constant 0 : index
    %c128 = arith.constant 128 : index
    %52 = vector.load %arg10[%c0_21, %c128] : memref<8x531xbf16, #tpu.memory_space<vmem>>, vector<8x384xbf16>
    tpu.vector_store %arg10[%c0_21, %c128], %51 {strides = array<i32>} : memref<8x531xbf16, #tpu.memory_space<vmem>>, vector<8x384xbf16>,
    %c0_22 = arith.constant 0 : index
    %c0_23 = arith.constant 0 : index
    %53 = vector.load %arg6[%c0_22, %c0_23] : memref<8x72xbf16, #tpu.memory_space<vmem>>, vector<8x72xbf16>
    %c0_24 = arith.constant 0 : index
    %c109_25 = arith.constant 109 : index
    %54 = vector.load %arg10[%c0_24, %c109_25] : memref<8x531xbf16, #tpu.memory_space<vmem>>, vector<8x384xbf16>
    %c0_26 = arith.constant 0 : index
    %c110 = arith.constant 110 : index
    %55 = vector.load %arg10[%c0_26, %c110] : memref<8x531xbf16, #tpu.memory_space<vmem>>, vector<8x384xbf16>
    %c0_27 = arith.constant 0 : index
    %c111 = arith.constant 111 : index
    %56 = vector.load %arg10[%c0_27, %c111] : memref<8x531xbf16, #tpu.memory_space<vmem>>, vector<8x384xbf16>
    %c0_28 = arith.constant 0 : index
    %c127 = arith.constant 127 : index
    %57 = vector.load %arg10[%c0_28, %c127] : memref<8x531xbf16, #tpu.memory_space<vmem>>, vector<8x384xbf16>
    %c0_29 = arith.constant 0 : index
    %c128_30 = arith.constant 128 : index
    %58 = vector.load %arg10[%c0_29, %c128_30] : memref<8x531xbf16, #tpu.memory_space<vmem>>, vector<8x384xbf16>
    %c0_31 = arith.constant 0 : index
    %c129 = arith.constant 129 : index
    %59 = vector.load %arg10[%c0_31, %c129] : memref<8x531xbf16, #tpu.memory_space<vmem>>, vector<8x384xbf16>
    %c0_32 = arith.constant 0 : index
    %c145 = arith.constant 145 : index
    %60 = vector.load %arg10[%c0_32, %c145] : memref<8x531xbf16, #tpu.memory_space<vmem>>, vector<8x384xbf16>
    %c0_33 = arith.constant 0 : index
    %c146 = arith.constant 146 : index
    %61 = vector.load %arg10[%c0_33, %c146] : memref<8x531xbf16, #tpu.memory_space<vmem>>, vector<8x384xbf16>
    %c0_34 = arith.constant 0 : index
    %c147 = arith.constant 147 : index
    %62 = vector.load %arg10[%c0_34, %c147] : memref<8x531xbf16, #tpu.memory_space<vmem>>, vector<8x384xbf16>
    %63 = tpu.concatenate %54, %55, %56, %57, %58, %59, %60, %61, %62 in 0 : vector<8x384xbf16>, vector<8x384xbf16>, vector<8x384xbf16>, vector<8x384xbf16>, vector<8x384xbf16>, vector<8x384xbf16>, vector<8x384xbf16>, vector<8x384xbf16>, vector<8x384xbf16> -> vector<72x384xbf16>
    %cst_35 = arith.constant dense<0.000000e+00> : vector<8x384xf32>
    %64 = tpu.matmul %53, %63, %cst_35 {dimension_numbers = #tpu.dot_dimension_numbers<[1], [0], [0], [1], [0, 0, 1, 1], [], []>} : vector<8x72xbf16>, vector<72x384xbf16>, vector<8x384xf32> -> vector<8x384xf32>
    %c0_36 = arith.constant 0 : index
    %c0_37 = arith.constant 0 : index
    %65 = vector.load %arg7[%c0_36, %c0_37] : memref<8x1xf32, #tpu.memory_space<vmem>>, vector<8x1xf32>
    %c0_38 = arith.constant 0 : index
    %c0_39 = arith.constant 0 : index
    %66 = vector.load %arg8[%c0_38, %c0_39] : memref<8x1xf32, #tpu.memory_space<vmem>>, vector<8x1xf32>
    %67 = vector.broadcast %0 : vector<1x384xf32> to vector<8x384xf32>
    %68 = arith.mulf %64, %67 : vector<8x384xf32>
    %cst_40 = arith.constant dense<0.000000e+00> : vector<8xf32>
    %69 = vector.multi_reduction <add>, %68, %cst_40 [1] : vector<8x384xf32> to vector<8xf32>
    %70 = vector.shape_cast %69 : vector<8xf32> to vector<8x1xf32>
    %cst_41 = arith.constant 3.906250e-03 : f32
    %71 = vector.broadcast %cst_41 : f32 to vector<8x1xf32>
    %72 = arith.mulf %70, %71 : vector<8x1xf32>
    %73 = arith.mulf %68, %64 : vector<8x384xf32>
    %cst_42 = arith.constant dense<0.000000e+00> : vector<8xf32>
    %74 = vector.multi_reduction <add>, %73, %cst_42 [1] : vector<8x384xf32> to vector<8xf32>
    %75 = vector.shape_cast %74 : vector<8xf32> to vector<8x1xf32>
    %cst_43 = arith.constant 3.906250e-03 : f32
    %76 = vector.broadcast %cst_43 : f32 to vector<8x1xf32>
    %77 = arith.mulf %75, %76 : vector<8x1xf32>
    %78 = arith.mulf %72, %72 : vector<8x1xf32>
    %79 = arith.subf %77, %78 : vector<8x1xf32>
    %cst_44 = arith.constant 0.000000e+00 : f32
    %80 = vector.broadcast %cst_44 : f32 to vector<8x1xf32>
    %81 = arith.maximumf %79, %80 : vector<8x1xf32>
    %cst_45 = arith.constant 9.99999974E-6 : f32
    %82 = vector.broadcast %cst_45 : f32 to vector<8x1xf32>
    %83 = arith.addf %81, %82 : vector<8x1xf32>
    %84 = math.rsqrt %83 : vector<8x1xf32>
    %85 = arith.mulf %65, %84 : vector<8x1xf32>
    %86 = arith.mulf %72, %85 : vector<8x1xf32>
    %87 = arith.subf %66, %86 : vector<8x1xf32>
    %88 = vector.broadcast %85 : vector<8x1xf32> to vector<8x384xf32>
    %89 = arith.mulf %64, %88 : vector<8x384xf32>
    %90 = vector.broadcast %87 : vector<8x1xf32> to vector<8x384xf32>
    %91 = arith.addf %89, %90 : vector<8x384xf32>
    %cst_46 = arith.constant 1.000000e-01 : f32
    %92 = vector.broadcast %cst_46 : f32 to vector<8x384xf32>
    %93 = arith.mulf %92, %91 : vector<8x384xf32>
    %94 = arith.maximumf %91, %93 : vector<8x384xf32>
    %95 = arith.addf %46, %94 : vector<8x384xf32>
    %c0_47 = arith.constant 0 : index
    %c0_48 = arith.constant 0 : index
    %c0_49 = arith.constant 0 : index
    %96 = vector.load %arg9[%c0_47, %c0_48, %c0_49] : memref<1x8x384xf32, #tpu.memory_space<vmem>>, vector<1x8x384xf32>
    %97 = vector.shape_cast %96 : vector<1x8x384xf32> to vector<8x384xf32>
    %98 = vector.shape_cast %95 : vector<8x384xf32> to vector<1x8x384xf32>
    tpu.vector_store %arg9[%c0_47, %c0_48, %c0_49], %98 {strides = array<i32>} : memref<1x8x384xf32, #tpu.memory_space<vmem>>, vector<1x8x384xf32>,
    return
  }
  func.func @transform_0(%arg0: i32) -> (i32, i32, i32) {
    %c0_i32 = arith.constant 0 : i32
    %c0_i32_0 = arith.constant 0 : i32
    %c0_i32_1 = arith.constant 0 : i32
    return %arg0, %c0_i32, %c0_i32_0 : i32, i32, i32
  }
  func.func @transform_1(%arg0: i32) -> (i32, i32) {
    %c0_i32 = arith.constant 0 : i32
    %c0_i32_0 = arith.constant 0 : i32
    %c0_i32_1 = arith.constant 0 : i32
    return %c0_i32, %c0_i32_0 : i32, i32
  }
  func.func @transform_2(%arg0: i32) -> (i32, i32) {
    %c0_i32 = arith.constant 0 : i32
    %c0_i32_0 = arith.constant 0 : i32
    %c0_i32_1 = arith.constant 0 : i32
    return %c0_i32, %c0_i32_0 : i32, i32
  }
  func.func @transform_3(%arg0: i32) -> (i32, i32) {
    %c0_i32 = arith.constant 0 : i32
    %c0_i32_0 = arith.constant 0 : i32
    %c0_i32_1 = arith.constant 0 : i32
    return %c0_i32, %c0_i32_0 : i32, i32
  }
  func.func @transform_4(%arg0: i32) -> (i32, i32) {
    %c0_i32 = arith.constant 0 : i32
    %c0_i32_0 = arith.constant 0 : i32
    %c0_i32_1 = arith.constant 0 : i32
    return %c0_i32, %c0_i32_0 : i32, i32
  }
  func.func @transform_5(%arg0: i32) -> (i32, i32) {
    %c0_i32 = arith.constant 0 : i32
    %c0_i32_0 = arith.constant 0 : i32
    %c0_i32_1 = arith.constant 0 : i32
    return %c0_i32, %c0_i32_0 : i32, i32
  }
  func.func @transform_6(%arg0: i32) -> (i32, i32) {
    %c0_i32 = arith.constant 0 : i32
    %c0_i32_0 = arith.constant 0 : i32
    %c0_i32_1 = arith.constant 0 : i32
    return %c0_i32, %c0_i32_0 : i32, i32
  }
  func.func @transform_7(%arg0: i32) -> (i32, i32) {
    %c0_i32 = arith.constant 0 : i32
    %c0_i32_0 = arith.constant 0 : i32
    %c0_i32_1 = arith.constant 0 : i32
    return %c0_i32, %c0_i32_0 : i32, i32
  }
  func.func @transform_8(%arg0: i32) -> (i32, i32, i32) {
    %c0_i32 = arith.constant 0 : i32
    %c0_i32_0 = arith.constant 0 : i32
    %c0_i32_1 = arith.constant 0 : i32
    return %arg0, %c0_i32, %c0_i32_0 : i32, i32, i32
  }
}

</mosaic_0001>

<bundles_post_ra>
// kernel: tpu_custom_call.1
= control target key start
LH: loop header
LB: loop body
LE: loop exit
PB: predicated region body
PF: predicated region fallthrough
CT: control target
= control target key end

     0   :  { %13 = vsyncpa [#allocation4], 0  ;;  %s1832_s0 = inlined_call_operand.hbm [shape: bf16[2,8,531], index: 0, kind: input, shape index: {}]   ;;  %s1833_s1 = inlined_call_operand.vmem [shape: f32[1,384], index: 1, kind: input, shape index: {}]   ;;  %s1834_s2 = inlined_call_operand.vmem [shape: bf16[8,72], index: 2, kind: input, shape index: {}]   ;;  %s1835_s3 = inlined_call_operand.vmem [shape: f32[8,1], index: 3, kind: input, shape index: {}]   ;;  %s1836_s4 = inlined_call_operand.vmem [shape: f32[8,1], index: 4, kind: input, shape index: {}]   ;;  %s1837_s5 = inlined_call_operand.vmem [shape: bf16[8,72], index: 5, kind: input, shape index: {}]   ;;  %s1838_s6 = inlined_call_operand.vmem [shape: f32[8,1], index: 6, kind: input, shape index: {}]   ;;  %s1839_s7 = inlined_call_operand.vmem [shape: f32[8,1], index: 7, kind: input, shape index: {}]   ;;  %s1840_s8 = inlined_call_operand.hbm [shape: f32[2,8,384], index: 8, kind: output, shape index: {}]  }
   0x1   :  { %15 = vsyncpa [#allocation4 + $0x1], 0 }
   0x2   :  { %16 = vsyncpa [#allocation5], 0 }
   0x3   :  { %18 = vsyncpa [#allocation5 + $0x1], 0  ;;  %s1376_s27 = smov 0   ;;  %s1378_s28 = smov 0  }
   0x4   :  { %s1380_s29 = smov 0   ;;  %s1382_s30 = smov 0  }
   0x5 LB: > { %1844 = sst [smem:[#allocation9_spill]] %s1315_s29  ;;  %s1397_s9 = sadd.s32 4294967295, %s1319_s30   ;;  %s1319_s30 = sphi %s1382_s30, %s1851_s30   ;;  %s1315_s29 = sphi %s1380_s29, %s1853_s29   ;;  %s1311_s28 = sphi %s1378_s28, %s1855_s28   ;;  %s1307_s27 = sphi %s1376_s27, %s1854_s27  }
   0x6   : > { %s1142_s10 = sadd.s32 4294967294, %s1319_s30   ;;  %s1401_s11 = sadd.s32 1, %s1319_s30  }
   0x7   : > { %1845 = sst [smem:[#allocation10_spill]] %s1401_s11  ;;  %s31_s12 = sadd.s32 1, %s1315_s29 }
   0x8   : > { %s28_s13 = ssub.s32 %s1319_s30, %s1401_s11  ;;  %p38_p0 = scmp.ne.s32.totalorder %s1315_s29, %s1311_s28 }
   0x9   : > { %p29_p1 = scmp.eq.s32.totalorder %s28_s13, 0  ;;  %p39_p2 = scmp.eq.s32.totalorder %s1319_s30, 0 }
   0xa   : > { %p44_p3 = scmp.ne.s32.totalorder %s1311_s28, %s1307_s27  ;;  %p45_p4 = scmp.eq.s32.totalorder %s1397_s9, 0 }
   0xb   : > { %s1413_s14 = scalar_select %p29_p1, %s1315_s29, %s31_s12  }
   0xc   : > { %p40_p5 = por %p39_p2, %p38_p0  ;;  %p1415_p6 = por %p45_p4, %p44_p3 }
   0xd   : > { %1846 = sst [smem:[#allocation11_spill]] %s1413_s14  ;;  %p215_p7 = scmp.eq.s32.totalorder %s1397_s9, 1 }
   0xe   : > { %p221_p8 = scmp.eq.s32.totalorder %s1142_s10, 1  ;;  %p1144_p9 = scmp.ge.s32.totalorder %s1319_s30, 2 }
   0xf   : > { %p1173_p10 = scmp.lt.s32.totalorder %s1319_s30, 2  ;;  %p1422_p11 = por %p215_p7, %p38_p0 }
  0x10   : > { %p1426_p12 = por %p221_p8, %p44_p3  ;;  %s262_s18 = sand.u32 1, %s1315_s29  }
  0x11   : > { %s1157_s19 = smul.u32 20, %s1319_s30  ;;  %p1435_p13 = pnand %p1173_p10, %p40_p5 }
  0x12   : > { %s1156_s20 = smul.u32 20, %s262_s18  ;;  %s263_s12 = scalar_lea.sflag [#allocation4], %s262_s18 }
  0x13   : > { %s271_s23 = scalar_lea.hbm %s1832_s0, %s1157_s19  ;;  %p1227_p1 = pneg %p1435_p13 }
  0x14   : > { %s273_s25 = sshll.u32 %s271_s23, 4  ;;  %s266_s26 = scalar_lea.vmem [#allocation3], %s1156_s20  ;;  %s274_s25 = int_to_ptr.hbm [resolvable:$true] %s273_s25 }
  0x15   : > { %s275_s10 = sshll.u32 %s266_s26, 4  ;;  %s1223_s13 = sshra.s32 %s274_s25, 4  ;;  %s276_s10 = int_to_ptr.vmem [resolvable:$true] %s275_s10  ;;  %s1224_s13 = int_to_ptr.hbm [resolvable:$true] %s1223_s13 }
  0x16   : > { %s1225_s14 = scalar_lea.hbm %s1224_s13, 20  ;;  %s1230_s22 = scalar_lea.hbm %s1832_s0, 40 }
  0x17   : > { %p1226_p0 = scmp.ne.s32.totalorder %s1224_s13, %s1225_s14  ;;  %p1231_p4 = scmp.lt.s32.totalorder %s1224_s13, %s1832_s0 }
  0x18   : > { %p1232_p5 = scmp.lt.s32.totalorder %s1230_s22, %s1225_s14 }
  0x19   : > { %p1228_p2 = pnand %p1227_p1, %p1226_p0 }
  0x1a   : > { %p1233_p7 = por %p1232_p5, %p1231_p4 }
  0x1b   : > { %p1229_p3 = pneg %p1228_p2 }
  0x1d   : > { %p1234_p8 = pnand %p1233_p7, %p1229_p3 }
  0x1f   : > { %1237 = shalt.err (!%p1234_p8)
}
  0x20   : > { %1168 = dma.hbm_to_vmem [thread:$0]  (!%p1435_p13), %s274_s25, 320, %s276_s10, %s263_s12  }
  0x21   : > { %p1146_p10 = scmp.ge.s32.totalorder %s1319_s30, 1  ;;  %p280_p0 = scmp.lt.s32.totalorder %s1319_s30, 3 }
  0x23   : > { %p281_p1 = pnand %p1146_p10, %p280_p0 }
  0x24   : > { %s1452_s18 = sand.u32 (!%p281_p1), 1, %s1311_s28  }
  0x25   : > { %284 = sbr.rel (%p281_p1) target bundleno = 1493 (0x5d5), region = 52  ;;  %s287_s11 = scalar_lea.sflag (!%p281_p1), [#allocation4], %s1452_s18 }
  0x26   : > { %s1158_s29 = smul.u32 (!%p281_p1), 20, %s1452_s18 }
  0x28   : > { %s290_s14 = scalar_lea.vmem (!%p281_p1), [#allocation3], %s1158_s29 }
  0x2a   : > { %1298 = dma.done.wait (%p1415_p6), %s287_s11, 320  }
  0x2b   : > { %1300 = vsyncadd (%p1415_p6), %s287_s11, 4294966976  ;;  %v328_v0 = vld [vmem:[%s290_s14 + $0x10] sm:$0xf]  ;;  %v327_v1 = vld [vmem:[%s290_s14 + $0x8] sm:$0xff]  ;;  %s1321_s20 = smov 90   ;;  %s1322_s23 = smov 92  }
  0x2c   : > { %v386_v2 = vunpack.c.l.b16 %v328_v0  ;;  %v334_v3 = vunpack.c.l.b16 %v327_v1  ;;  %v335_v4 = vunpack.c.h.b16 %v327_v1  ;;  %v326_v8 = vld [vmem:[%s290_s14] sm:$0xff]  ;;  %s1323_s15 = smov 91   ;;  %s1324_s24 = smov 109   ;;  %vm432_vm0 = vcmask 736256  }
  0x2d   : > { %v333_v9 = vunpack.c.h.b16 %v326_v8  ;;  %s1325_s25 = smov 108   ;;  %s1326_s26 = smov 126   ;;  %v332_v11 = vunpack.c.l.b16 %v326_v8  ;;  %vm408_vm1 = vcmask 752640   ;;  %vm420_vm2 = vcmask 744448  }
  0x2e   : > { %v387_v5 = vpack.c.b16 %v386_v2, %v386_v2  ;;  %v1460_v6 = vpack.c.b16 %v334_v3, %v334_v3  ;;  %v1462_v7 = vpack.c.b16 %v335_v4, %v335_v4  ;;  %s1327_s10 = smov 110   ;;  %s1328_s12 = smov 127   ;;  %vm436_vm3 = vcmask 1043456  }
  0x2f   : > { %v1479_v10 = vpack.c.b16 %v333_v9, %v333_v9  ;;  %v1510_v12 = vpack.c.b16 %v332_v11, %v332_v11  ;;  %s1329_s13 = smov 19   ;;  %vm396_vm4 = vcmask 883712   ;;  %vm372_vm5 = vcmask 900096  }
  0x30   : > { %430 = vrot.lane.b32.xlu1 %v387_v5, %s1321_s20  ;;  %426 = vrot.lane.b32.xlu0 %v1460_v6, %s1321_s20  ;;  %vm360_vm6 = vcmask 1031168   ;;  %vm382_vm7 = vcmask 891904   ;;  %vm348_vm8 = vcmask 1039360   ;;  %vm541_vm9 = vcmask 154624  }
  0x31   : > { %404 = vrot.lane.b32.xlu2 %v1462_v7, %s1322_s23  ;;  %vm569_vm10 = vcmask 588800   ;;  %vm688_vm11 = vcmask 1044328   ;;  %vm690_vm12 = vcmask 150528  }
  0x38   : > { %402 = vrot.lane.b32.xlu1 %v1460_v6, %s1322_s23  ;;  %428 = vrot.lane.b32.xlu0 %v1462_v7, %s1321_s20 }
  0x39   : > { %406 = vrot.lane.b32.xlu2 %v387_v5, %s1322_s23 }
  0x40   : > { %416 = vrot.lane.b32.xlu1 %v1462_v7, %s1323_s15  ;;  %414 = vrot.lane.b32.xlu0 %v1460_v6, %s1323_s15 }
  0x41   : > { %418 = vrot.lane.b32.xlu2 %v387_v5, %s1323_s15 }
  0x48   : > { %378 = vrot.lane.b32.xlu1 %v1460_v6, %s1324_s24  ;;  %424 = vrot.lane.b32.xlu0 %v1479_v10, %s1321_s20 }
  0x49   : > { %380 = vrot.lane.b32.xlu2 %v1462_v7, %s1324_s24 }
  0x50   : > { %392 = vrot.lane.b32.xlu1 %v1462_v7, %s1325_s25  ;;  %390 = vrot.lane.b32.xlu0 %v1460_v6, %s1325_s25 }
  0x51   : > { %394 = vrot.lane.b32.xlu2 %v387_v5, %s1325_s25 }
  0x58   : > { %412 = vrot.lane.b32.xlu1 %v1479_v10, %s1323_s15  ;;  %400 = vrot.lane.b32.xlu0 %v1479_v10, %s1322_s23 }
  0x59   : > { %356 = vrot.lane.b32.xlu2 %v1460_v6, %s1326_s26 }
  0x60   : > { %368 = vrot.lane.b32.xlu1 %v1460_v6, %s1327_s10  ;;  %358 = vrot.lane.b32.xlu0 %v1462_v7, %s1326_s26 }
  0x61   : > { %370 = vrot.lane.b32.xlu2 %v1462_v7, %s1327_s10 }
  0x68   : > { %388 = vrot.lane.b32.xlu1 %v1479_v10, %s1325_s25  ;;  %376 = vrot.lane.b32.xlu0 %v1479_v10, %s1324_s24 }
  0x69   : > { %344 = vrot.lane.b32.xlu2 %v1460_v6, %s1328_s12 }
  0x70   : > { %346 = vrot.lane.b32.xlu0 %v1462_v7, %s1328_s12  ;;  %352 = vrot.lane.b32.xlu1 %v1510_v12, %s1326_s26 }
  0x71   : > { %354 = vrot.lane.b32.xlu2 %v1479_v10, %s1326_s26 }
  0x78   : > { %364 = vrot.lane.b32.xlu0 %v1510_v12, %s1327_s10  ;;  %366 = vrot.lane.b32.xlu1 %v1479_v10, %s1327_s10 }
  0x79   : > { %340 = vrot.lane.b32.xlu2 %v1510_v12, %s1328_s12 }
  0x80   : > { %342 = vrot.lane.b32.xlu0 %v1479_v10, %s1328_s12 }
  0x8b   : > { %v405_v13 = vpop.permute.xlu2 %404 }
  0x93   : > { %v407_v14 = vpop.permute.xlu2 %406 }
  0x94   : > { %v411_v48 = vsel %vm408_vm1, %v405_v13, %v407_v14 }
  0x9b   : > { %v419_v17 = vpop.permute.xlu2 %418 }
  0xa2   : > { %v431_v15 = vpop.permute.xlu1 %430  ;;  %v427_v16 = vpop.permute.xlu0 %426 }
  0xa3   : > { %v381_v25 = vpop.permute.xlu2 %380 }
  0xaa   : > { %v1526_v18 = vpop.permute.xlu1 %402  ;;  %v429_v19 = vpop.permute.xlu0 %428 }
  0xab   : > { %v435_v20 = vsel %vm432_vm0, %v429_v19, %v431_v15  ;;  %v434_v21 = vsel %vm432_vm0, %v427_v16, %v429_v19  ;;  %v410_v24 = vsel %vm408_vm1, %v1526_v18, %v405_v13  ;;  %v395_v31 = vpop.permute.xlu2 %394 }
  0xac   : > { %539 = vrot.lane.b32.xlu2 %v435_v20, %s1329_s13  ;;  %537 = vrot.lane.b32.xlu1 %v434_v21, %s1329_s13 }
  0xb2   : > { %v417_v22 = vpop.permute.xlu1 %416  ;;  %v415_v23 = vpop.permute.xlu0 %414 }
  0xb3   : > { %v422_v26 = vsel %vm420_vm2, %v415_v23, %v417_v22  ;;  %v357_v36 = vpop.permute.xlu2 %356  ;;  %v423_v47 = vsel %vm420_vm2, %v417_v22, %v419_v17 }
  0xb4   : > { %v481_v27 = vsel %vm436_vm3, %v410_v24, %v422_v26  ;;  %v484_v53 = vsel %vm436_vm3, %v411_v48, %v423_v47 }
  0xb5   : > { %529 = vrot.lane.b32.xlu2 %v481_v27, %s1329_s13 }
  0xba   : > { %v379_v28 = vpop.permute.xlu1 %378  ;;  %v425_v29 = vpop.permute.xlu0 %424 }
  0xbb   : > { %533 = vrot.lane.b32.xlu0 %v425_v29, %s1329_s13  ;;  %v433_v30 = vsel %vm432_vm0, %v425_v29, %v427_v16  ;;  %v371_v40 = vpop.permute.xlu2 %370  ;;  %v384_v58 = vsel %vm382_vm7, %v379_v28, %v381_v25 }
  0xbc   : > { %535 = vrot.lane.b32.xlu1 %v433_v30, %s1329_s13 }
  0xc2   : > { %v393_v32 = vpop.permute.xlu1 %392  ;;  %v391_v33 = vpop.permute.xlu0 %390 }
  0xc3   : > { %v399_v34 = vsel %vm396_vm4, %v393_v32, %v395_v31  ;;  %v345_v56 = vpop.permute.xlu2 %344  ;;  %v398_v57 = vsel %vm396_vm4, %v391_v33, %v393_v32 }
  0xc4   : > { %v472_v35 = vsel %vm436_vm3, %v381_v25, %v399_v34  ;;  %v469_v62 = vsel %vm436_vm3, %v384_v58, %v398_v57  ;;  %v325_v58 = vld [vmem:[%s1833_s1] sm:$0x7] }
  0xc5   : > { %523 = vrot.lane.b32.xlu2 %v472_v35, %s1329_s13 }
  0xca   : > { %v413_v37 = vpop.permute.xlu1 %412  ;;  %v401_v38 = vpop.permute.xlu0 %400 }
  0xcb   : > { %v475_v39 = vsel %vm436_vm3, %v401_v38, %v413_v37  ;;  %v421_v0 = vsel %vm420_vm2, %v413_v37, %v415_v23  ;;  %v409_v1 = vsel %vm408_vm1, %v401_v38, %v1526_v18  ;;  %v355_v2 = vpop.permute.xlu2 %354 }
  0xcc   : > { %525 = vrot.lane.b32.xlu0 %v475_v39, %s1329_s13  ;;  %v362_v8 = vsel %vm360_vm6, %v355_v2, %v357_v36 }
  0xd2   : > { %v369_v41 = vpop.permute.xlu1 %368  ;;  %v359_v42 = vpop.permute.xlu0 %358 }
  0xd3   : > { %v375_v43 = vsel %vm372_vm5, %v369_v41, %v371_v40  ;;  %v363_v44 = vsel %vm360_vm6, %v357_v36, %v359_v42  ;;  %v460_v45 = vsel %vm436_vm3, %v359_v42, %v371_v40  ;;  %v341_v18 = vpop.permute.xlu2 %340 }
  0xd4   : > { %515 = vrot.lane.b32.xlu0 %v460_v45, %s1329_s13  ;;  %v457_v46 = vsel %vm436_vm3, %v363_v44, %v375_v43 }
  0xd5   : > { %513 = vrot.lane.b32.xlu2 %v457_v46, %s1329_s13 }
  0xda   : > { %v389_v49 = vpop.permute.xlu1 %388  ;;  %v377_v50 = vpop.permute.xlu0 %376 }
  0xdb   : > { %v397_v51 = vsel %vm396_vm4, %v389_v49, %v391_v33  ;;  %v383_v52 = vsel %vm382_vm7, %v377_v50, %v379_v28  ;;  %v463_v54 = vsel %vm436_vm3, %v377_v50, %v389_v49 }
  0xdc   : > { %531 = vrot.lane.b32.xlu0 %v484_v53, %s1329_s13  ;;  %517 = vrot.lane.b32.xlu1 %v463_v54, %s1329_s13  ;;  %v466_v55 = vsel %vm436_vm3, %v383_v52, %v397_v51  ;;  %v329_v53 = vld [vmem:[%s1834_s2] sm:$0xf] }
  0xdd   : > { %519 = vrot.lane.b32.xlu2 %v466_v55, %s1329_s13 }
  0xe2   : > { %v347_v59 = vpop.permute.xlu0 %346  ;;  %v353_v60 = vpop.permute.xlu1 %352 }
  0xe3   : > { %v351_v61 = vsel %vm348_vm8, %v345_v56, %v347_v59  ;;  %v361_v3 = vsel %vm360_vm6, %v353_v60, %v355_v2  ;;  %v448_v17 = vsel %vm436_vm3, %v1462_v7, %v347_v59  ;;  %v1620_v59 = vperm.slane %v325_v58, 1 }
  0xe4   : > { %521 = vrot.lane.b32.xlu1 %v469_v62, %s1329_s13  ;;  %v445_v63 = vsel %vm436_vm3, %v1460_v6, %v351_v61  ;;  %v478_v6 = vsel %vm436_vm3, %v409_v1, %v421_v0  ;;  %v1622_v61 = vperm.slane %v325_v58, 0  ;;  %v1624_v62 = vperm.slane %v325_v58, 2 }
  0xe5   : > { %505 = vrot.lane.b32.xlu0 %v445_v63, %s1329_s13 }
  0xea   : > { %v365_v4 = vpop.permute.xlu0 %364  ;;  %v367_v5 = vpop.permute.xlu1 %366 }
  0xeb   : > { %v373_v9 = vsel %vm372_vm5, %v365_v4, %v367_v5  ;;  %v374_v11 = vsel %vm372_vm5, %v367_v5, %v369_v41 }
  0xec   : > { %527 = vrot.lane.b32.xlu1 %v478_v6, %s1329_s13  ;;  %v454_v13 = vsel %vm436_vm3, %v362_v8, %v374_v11  ;;  %v451_v14 = vsel %vm436_vm3, %v361_v3, %v373_v9 }
  0xed   : > { %511 = vrot.lane.b32.xlu0 %v454_v13, %s1329_s13  ;;  %509 = vrot.lane.b32.xlu2 %v451_v14, %s1329_s13 }
  0xf2   : > { %v343_v15 = vpop.permute.xlu0 %342 }
  0xf3   : > { %v350_v16 = vsel %vm348_vm8, %v343_v15, %v345_v56  ;;  %v349_v20 = vsel %vm348_vm8, %v341_v18, %v343_v15 }
  0xf4   : > { %507 = vrot.lane.b32.xlu1 %v448_v17, %s1329_s13  ;;  %v442_v19 = vsel %vm436_vm3, %v1479_v10, %v350_v16  ;;  %v439_v21 = vsel %vm436_vm3, %v1510_v12, %v349_v20  ;;  %v1330_v17 = vmov 0  }
  0xf5   : > { %503 = vrot.lane.b32.xlu2 %v442_v19, %s1329_s13  ;;  %689 = vst.msk [vmem:[#allocation2] sm:$0xf] %vm688_vm11, %v1330_v17  ;;  %1218 = vset.pattern.permute.xlu0 %v1330_v17 }
  0xf6   : > { %1217 = vset.pattern.permute.xlu2 %v1330_v17  ;;  %691 = vst.msk [vmem:[#allocation2 + $0x10] sm:$0xf] %vm690_vm12, %v1330_v17 }
  0xfc   : > { %501 = vrot.lane.b32.xlu1 %v439_v21, %s1329_s13 }
 0x106   : > { %v540_v22 = vpop.permute.xlu2 %539 }
 0x10f   : > { %v530_v29 = vpop.permute.xlu2 %529 }
 0x11e   : > { %v538_v23 = vpop.permute.xlu1 %537 }
 0x11f   : > { %v556_v7 = vsel %vm541_vm9, %v538_v23, %v540_v22  ;;  %v524_v31 = vpop.permute.xlu2 %523 }
 0x120   : > { %v580_v24 = vsel %vm436_vm3, %v556_v7, 0 }
 0x121   : > { %611 = vmatpush.bf16.msra.mxu2 %v580_v24 }
 0x12d   : > { %v534_v25 = vpop.permute.xlu0 %533 }
 0x12e   : > { %v536_v26 = vpop.permute.xlu1 %535 }
 0x12f   : > { %v554_v10 = vsel %vm541_vm9, %v534_v25, %v536_v26  ;;  %v555_v27 = vsel %vm541_vm9, %v536_v26, %v538_v23  ;;  %v514_v33 = vpop.permute.xlu2 %513 }
 0x130   : > { %v574_v28 = vsel %vm436_vm3, %v554_v10, 0  ;;  %v577_v12 = vsel %vm436_vm3, %v555_v27, 0 }
 0x131   : > { %585 = vmatpush.bf16.msra.mxu0 %v574_v28  ;;  %598 = vmatpush.bf16.msra.mxu1 %v577_v12  ;;  %v621_v12 = vld [vmem:[%s1835_s3] sm:$0xff] }
 0x137   : > { %v520_v39 = vpop.permute.xlu2 %519 }
 0x13e   : > { %v526_v30 = vpop.permute.xlu0 %525 }
 0x146   : > { %v516_v32 = vpop.permute.xlu0 %515 }
 0x147   : > { %v547_v41 = vsel %vm541_vm9, %v514_v33, %v516_v32  ;;  %v510_v45 = vpop.permute.xlu2 %509 }
 0x14e   : > { %v532_v34 = vpop.permute.xlu0 %531  ;;  %v518_v35 = vpop.permute.xlu1 %517 }
 0x14f   : > { %v553_v36 = vsel %vm541_vm9, %v530_v29, %v532_v34  ;;  %v548_v46 = vsel %vm541_vm9, %v518_v35, %v520_v39  ;;  %v504_v54 = vpop.permute.xlu2 %503 }
 0x150   : > { %612 = vmatpush.bf16.msra.mxu2 %v553_v36 }
 0x156   : > { %v522_v37 = vpop.permute.xlu1 %521 }
 0x157   : > { %v550_v38 = vsel %vm541_vm9, %v522_v37, %v524_v31  ;;  %v506_v40 = vpop.permute.xlu0 %505  ;;  %v549_v47 = vsel %vm541_vm9, %v520_v39, %v522_v37 }
 0x158   : > { %613 = vmatpush.bf16.msra.mxu2 %v550_v38  ;;  %v543_v55 = vsel %vm541_vm9, %v504_v54, %v506_v40 }
 0x15c   : > { %614 = vmatpush.bf16.msra.mxu2 %v547_v41 }
 0x15e   : > { %v528_v42 = vpop.permute.xlu1 %527 }
 0x15f   : > { %v551_v43 = vsel %vm541_vm9, %v526_v30, %v528_v42  ;;  %v552_v44 = vsel %vm541_vm9, %v528_v42, %v530_v29  ;;  %v512_v48 = vpop.permute.xlu0 %511 }
 0x160   : > { %586 = vmatpush.bf16.msra.mxu0 %v551_v43  ;;  %599 = vmatpush.bf16.msra.mxu1 %v552_v44  ;;  %v545_v50 = vsel %vm541_vm9, %v510_v45, %v512_v48  ;;  %v546_v51 = vsel %vm541_vm9, %v512_v48, %v514_v33  ;;  %v622_v33 = vld [vmem:[%s1836_s4] sm:$0xff] }
 0x164   : > { %587 = vmatpush.bf16.msra.mxu0 %v548_v46  ;;  %600 = vmatpush.bf16.msra.mxu1 %v549_v47 }
 0x166   : > { %v508_v49 = vpop.permute.xlu1 %507 }
 0x167   : > { %v544_v52 = vsel %vm541_vm9, %v506_v40, %v508_v49 }
 0x168   : > { %588 = vmatpush.bf16.msra.mxu0 %v545_v50  ;;  %601 = vmatpush.bf16.msra.mxu1 %v546_v51 }
 0x169   : > { %615 = vmatpush.bf16.msra.mxu2 %v544_v52 }
 0x16c   : > { %1149 = vmatmul.msk.bf16.vlgmr.msra.gmra.mxu2 %vm569_vm10, %v329_v53  ;;  %602 = vmatpush.bf16.msra.mxu1 %v543_v55 }
 0x16e   : > { %v502_v56 = vpop.permute.xlu1 %501 }
 0x16f   : > { %1148 = vmatmul.msk.bf16.vlgmr.msra.gmra.mxu1 %vm569_vm10, %v329_v53  ;;  %v542_v57 = vsel %vm541_vm9, %v502_v56, %v504_v54 }
 0x170   : > { %589 = vmatpush.bf16.msra.mxu0 %v542_v57 }
 0x173   : > { %1147 = vmatmul.msk.bf16.vlgmr.msra.gmra.mxu0 %vm569_vm10, %v329_v53 }
 0x1ec   : > { %v604_v60 = vpop.f32.mrf.mxu1 }
 0x1ed   : > { %v631_v63 = vmul.f32 %v1620_v59, %v604_v60 }
 0x1ef   : > { %v617_v0 = vpop.f32.mrf.mxu2  ;;  %v639_v4 = vmul.f32 %v631_v63, %v604_v60 }
 0x1f0   : > { %v591_v1 = vpop.f32.mrf.mxu0  ;;  %v632_v3 = vmul.f32 %v1624_v62, %v617_v0 }
 0x1f1   : > { %v630_v2 = vmul.f32 %v1622_v61, %v591_v1 }
 0x1f2   : > { %v640_v6 = vmul.f32 %v632_v3, %v617_v0 }
 0x1f3   : > { %v638_v5 = vmul.f32 %v630_v2, %v591_v1  ;;  %v633_v8 = vadd.f32 %v631_v63, %v630_v2 }
 0x1f4   : > { %v606_v9 = vpop.f32.mrf.mxu1 }
 0x1f5   : > { %v634_v11 = vadd.f32 %v633_v8, %v632_v3  ;;  %v641_v13 = vadd.f32 %v639_v4, %v638_v5 }
 0x1f7   : > { %v619_v14 = vpop.f32.mrf.mxu2  ;;  %635 = vadd.xlane.f32.xlu0 %v634_v11  ;;  %v642_v15 = vadd.f32 %v641_v13, %v640_v6 }
 0x1f8   : > { %v593_v16 = vpop.f32.mrf.mxu0 }
 0x1f9   : > { %643 = vadd.xlane.f32.xlu1 %v642_v15 }
 0x26a   : > { %v636_v18 = vpop.xlane.xlu0 %635 }
 0x26b   : > { %v637_v19 = vmul.f32 0.00390625, %v636_v18 }
 0x26c   : > { %v644_v20 = vpop.xlane.xlu1 %643 }
 0x26d   : > { %v646_v21 = vmul.f32 %v637_v19, %v637_v19  ;;  %v645_v22 = vmul.f32 0.00390625, %v644_v20 }
 0x26f   : > { %v647_v23 = vsub.f32 %v645_v22, %v646_v21 }
 0x271   : > { %v648_v7 = vmax.f32 %v647_v23, 0.0 }
 0x273   : > { %v649_v24 = vadd.f32 1e-05, %v648_v7 }
 0x275   : > { %1219 = vrsqrt.f32 %v649_v24  ;;  %vm656_vm14 = vweird.f32 %v649_v24 }
 0x27b   : > { %v1220_v25 = vpop.eup %1219 }
 0x27c   : > { %v651_v26 = vmul.f32 %v1220_v25, %v649_v24  ;;  %vm657_vm13 = vweird.f32 %v1220_v25 }
 0x27d   : > { %vm658_vm15 = vmor %vm656_vm14, %vm657_vm13 }
 0x27e   : > { %v652_v10 = vmul.f32 %v1220_v25, %v651_v26 }
 0x280   : > { %v653_v27 = vmul.f32 0.5, %v652_v10 }
 0x282   : > { %v654_v28 = vsub.f32 1.5, %v653_v27 }
 0x284   : > { %v655_v29 = vmul.f32 %v1220_v25, %v654_v28 }
 0x286   : > { %v659_v30 = vsel %vm658_vm15, %v1220_v25, %v655_v29 }
 0x287   : > { %v660_v31 = vmul.f32 %v659_v30, %v621_v12 }
 0x289   : > { %665 = vperm.xlu2 %1217, %v660_v31   ;;  %v661_v32 = vmul.f32 %v660_v31, %v637_v19 }
 0x28b   : > { %v662_v34 = vsub.f32 %v622_v33, %v661_v32 }
 0x291   : > { %673 = vperm.xlu2 %1217, %v662_v34  }
 0x2e3   : > { %v666_v35 = vpop.permute.xlu2 %665 }
 0x2e4   : > { %v668_v36 = vmul.f32 %v666_v35, %v591_v1  ;;  %v669_v37 = vmul.f32 %v666_v35, %v604_v60  ;;  %v670_v38 = vmul.f32 %v666_v35, %v617_v0 }
 0x2eb   : > { %v674_v39 = vpop.permute.xlu2 %673 }
 0x2ec   : > { %v676_v40 = vadd.f32 %v674_v39, %v668_v36  ;;  %v677_v41 = vadd.f32 %v674_v39, %v669_v37  ;;  %v678_v42 = vadd.f32 %v674_v39, %v670_v38 }
 0x2ee   : > { %v679_v43 = vmul.f32 0.1, %v676_v40  ;;  %v680_v44 = vmul.f32 0.1, %v677_v41  ;;  %v681_v45 = vmul.f32 0.1, %v678_v42 }
 0x2f0   : > { %v682_v46 = vmax.f32 %v676_v40, %v679_v43  ;;  %v683_v47 = vmax.f32 %v677_v41, %v680_v44  ;;  %v684_v48 = vmax.f32 %v678_v42, %v681_v45 }
 0x2f2   : > { %v1636_v49 = vmul.f32 %v682_v46, %v1622_v61  ;;  %v1639_v50 = vmul.f32 %v683_v47, %v1620_v59  ;;  %v1642_v51 = vmul.f32 %v684_v48, %v1624_v62 }
 0x2f4   : > { %v692_v52 = vpack.c.bf16 %v1639_v50, %v1636_v49  ;;  %v693_v53 = vpack.c.bf16 %v1642_v51, %v1642_v51 }
 0x2f6   : > { %694 = vst [vmem:[#allocation2 + $0x4] sm:$0xff] %v692_v52  ;;  %v748_v54 = vunpack.c.h.b16 %v692_v52  ;;  %v747_v55 = vunpack.c.l.b16 %v692_v52 }
 0x2f7   : > { %695 = vst [vmem:[#allocation2 + $0xc] sm:$0xf] %v693_v53 }
 0x2f8   : > { %v751_v56 = vpack.c.b16 %v748_v54, %v748_v54  ;;  %v750_v57 = vpack.c.b16 %v747_v55, %v747_v55 }
 0x2fa   : > { %790 = vrot.lane.b32.xlu1 %v751_v56, %s1323_s15  ;;  %788 = vrot.lane.b32.xlu0 %v750_v57, %s1323_s15 }
 0x2fb   : > { %799 = vrot.lane.b32.xlu2 %v750_v57, %s1321_s20 }
 0x2fd   : > { %v697_v3 = vld [vmem:[#allocation2] sm:$0xff] }
 0x2fe   : > { %v701_v58 = vld [vmem:[#allocation2 + $0xc] sm:$0xff]  ;;  %v704_v5 = vunpack.c.l.b16 %v697_v3  ;;  %v705_v14 = vunpack.c.h.b16 %v697_v3 }
 0x2ff   : > { %v762_v60 = vunpack.c.l.b16 %v701_v58  ;;  %v763_v63 = vunpack.c.h.b16 %v701_v58  ;;  %v698_v2 = vld [vmem:[#allocation2 + $0x8] sm:$0xff] }
 0x300   : > { %v706_v4 = vunpack.c.l.b16 %v698_v2  ;;  %v1659_v9 = vpack.c.b16 %v704_v5, %v704_v5  ;;  %v700_v11 = vld [vmem:[#allocation2 + $0xc] sm:$0xf]  ;;  %v1674_v15 = vpack.c.b16 %v705_v14, %v705_v14  ;;  %v707_v16 = vunpack.c.h.b16 %v698_v2 }
 0x301   : > { %v764_v0 = vpack.c.b16 %v762_v60, %v762_v60  ;;  %v765_v1 = vpack.c.b16 %v763_v63, %v763_v63  ;;  %v749_v6 = vunpack.c.l.b16 %v700_v11 }
 0x302   : > { %768 = vrot.lane.b32.xlu1 %v751_v56, %s1325_s25  ;;  %755 = vrot.lane.b32.xlu0 %v751_v56, %s1324_s24  ;;  %v1657_v8 = vpack.c.b16 %v706_v4, %v706_v4  ;;  %v1680_v17 = vpack.c.b16 %v707_v16, %v707_v16 }
 0x303   : > { %801 = vrot.lane.b32.xlu2 %v751_v56, %s1321_s20  ;;  %v752_v13 = vpack.c.b16 %v749_v6, %v749_v6 }
 0x30a   : > { %792 = vrot.lane.b32.xlu1 %v764_v0, %s1323_s15  ;;  %805 = vrot.lane.b32.xlu0 %v765_v1, %s1321_s20 }
 0x30b   : > { %777 = vrot.lane.b32.xlu2 %v750_v57, %s1322_s23 }
 0x312   : > { %727 = vrot.lane.b32.xlu1 %v1657_v8, %s1326_s26  ;;  %723 = vrot.lane.b32.xlu0 %v1659_v9, %s1326_s26 }
 0x313   : > { %779 = vrot.lane.b32.xlu2 %v751_v56, %s1322_s23 }
 0x31a   : > { %738 = vrot.lane.b32.xlu1 %v1657_v8, %s1327_s10  ;;  %734 = vrot.lane.b32.xlu0 %v1659_v9, %s1327_s10 }
 0x31b   : > { %803 = vrot.lane.b32.xlu2 %v764_v0, %s1321_s20 }
 0x322   : > { %757 = vrot.lane.b32.xlu1 %v752_v13, %s1324_s24  ;;  %783 = vrot.lane.b32.xlu0 %v765_v1, %s1322_s23 }
 0x323   : > { %753 = vrot.lane.b32.xlu2 %v750_v57, %s1324_s24  ;;  %s1273_s24 = scalar_lea.hbm %s1840_s8, 48 }
 0x32a   : > { %714 = vrot.lane.b32.xlu1 %v1674_v15, %s1328_s12  ;;  %770 = vrot.lane.b32.xlu0 %v764_v0, %s1325_s25 }
 0x32b   : > { %766 = vrot.lane.b32.xlu2 %v750_v57, %s1325_s25 }
 0x332   : > { %729 = vrot.lane.b32.xlu1 %v1680_v17, %s1326_s26  ;;  %716 = vrot.lane.b32.xlu0 %v1657_v8, %s1328_s12 }
 0x333   : > { %781 = vrot.lane.b32.xlu2 %v764_v0, %s1322_s23 }
 0x33a   : > { %740 = vrot.lane.b32.xlu0 %v1680_v17, %s1327_s10 }
 0x33b   : > { %725 = vrot.lane.b32.xlu2 %v1674_v15, %s1326_s26 }
 0x343   : > { %736 = vrot.lane.b32.xlu2 %v1674_v15, %s1327_s10  ;;  %s1159_s10 = smul.u32 24, %s1452_s18 }
 0x345   : > { %s323_s11 = scalar_lea.vmem [#allocation6], %s1159_s10 }
 0x346   : > { %s1069_s14 = sshll.u32 %s323_s11, 4  ;;  %s1070_s14 = int_to_ptr.vmem [resolvable:$true] %s1069_s14 }
 0x34b   : > { %794 = vrot.lane.b32.xlu2 %v765_v1, %s1323_s15 }
 0x353   : > { %712 = vrot.lane.b32.xlu2 %v1659_v9, %s1328_s12 }
 0x355   : > { %v800_v18 = vpop.permute.xlu2 %799 }
 0x356   : > { %906 = vrot.lane.b32.xlu1 %v800_v18, %s1329_s13 }
 0x35b   : > { %772 = vrot.lane.b32.xlu2 %v765_v1, %s1325_s25 }
 0x35d   : > { %v802_v19 = vpop.permute.xlu2 %801 }
 0x35e   : > { %v807_v20 = vsel %vm432_vm0, %v800_v18, %v802_v19 }
 0x35f   : > { %908 = vrot.lane.b32.xlu0 %v807_v20, %s1329_s13 }
 0x363   : > { %718 = vrot.lane.b32.xlu2 %v1680_v17, %s1328_s12  ;;  %s1160_s12 = smul.u32 24, %s1397_s9  ;;  %s1056_s9 = scalar_lea.sflag [#allocation5], %s1452_s18 }
 0x365   : > { %v778_v21 = vpop.permute.xlu2 %777  ;;  %s1067_s29 = scalar_lea.hbm %s1840_s8, %s1160_s12 }
 0x366   : > { %s1071_s19 = sshll.u32 %s1067_s29, 4  ;;  %s1072_s19 = int_to_ptr.hbm [resolvable:$true] %s1071_s19 }
 0x367   : > { %s1267_s21 = sshra.s32 %s1072_s19, 4  ;;  %s1268_s21 = int_to_ptr.hbm [resolvable:$true] %s1267_s21 }
 0x368   : > { %s1269_s20 = scalar_lea.hbm %s1268_s21, 24  ;;  %p1274_p3 = scmp.lt.s32.totalorder %s1268_s21, %s1840_s8 }
 0x369   : > { %p1270_p6 = scmp.ne.s32.totalorder %s1268_s21, %s1269_s20  ;;  %p1275_p4 = scmp.lt.s32.totalorder %s1273_s24, %s1269_s20 }
 0x36b   : > { %p1271_p13 = pnand %p1270_p6, %p1422_p11  ;;  %p1276_p5 = por %p1275_p4, %p1274_p3 }
 0x36c   : > { %v789_v22 = vpop.permute.xlu0 %788  ;;  %v791_v24 = vpop.permute.xlu1 %790 }
 0x36d   : > { %v780_v23 = vpop.permute.xlu2 %779  ;;  %v848_v7 = vsel %vm436_vm3, %v778_v21, %v789_v22  ;;  %v796_v37 = vsel %vm420_vm2, %v789_v22, %v791_v24  ;;  %p1272_p2 = pneg %p1271_p13 }
 0x36e   : > { %898 = vrot.lane.b32.xlu2 %v848_v7, %s1329_s13  ;;  %v785_v38 = vsel %vm408_vm1, %v778_v21, %v780_v23 }
 0x36f   : > { %v851_v44 = vsel %vm436_vm3, %v785_v38, %v796_v37  ;;  %p1277_p7 = pnand %p1276_p5, %p1272_p2 }
 0x374   : > { %v756_v25 = vpop.permute.xlu0 %755  ;;  %v769_v27 = vpop.permute.xlu1 %768 }
 0x375   : > { %v804_v26 = vpop.permute.xlu2 %803 }
 0x376   : > { %v808_v10 = vsel %vm432_vm0, %v802_v19, %v804_v26 }
 0x377   : > { %910 = vrot.lane.b32.xlu0 %v808_v10, %s1329_s13 }
 0x37c   : > { %v806_v28 = vpop.permute.xlu0 %805  ;;  %v793_v30 = vpop.permute.xlu1 %792 }
 0x37d   : > { %v754_v12 = vpop.permute.xlu2 %753  ;;  %v809_v29 = vsel %vm432_vm0, %v804_v26, %v806_v28  ;;  %v797_v42 = vsel %vm420_vm2, %v791_v24, %v793_v30 }
 0x37e   : > { %912 = vrot.lane.b32.xlu2 %v809_v29, %s1329_s13  ;;  %v759_v33 = vsel %vm382_vm7, %v754_v12, %v756_v25 }
 0x384   : > { %v724_v31 = vpop.permute.xlu0 %723  ;;  %v728_v39 = vpop.permute.xlu1 %727 }
 0x385   : > { %v767_v32 = vpop.permute.xlu2 %766 }
 0x386   : > { %v774_v34 = vsel %vm396_vm4, %v767_v32, %v769_v27  ;;  %v836_v35 = vsel %vm436_vm3, %v754_v12, %v767_v32 }
 0x387   : > { %890 = vrot.lane.b32.xlu1 %v836_v35, %s1329_s13  ;;  %v839_v36 = vsel %vm436_vm3, %v759_v33, %v774_v34 }
 0x388   : > { %892 = vrot.lane.b32.xlu0 %v839_v36, %s1329_s13 }
 0x38c   : > { %v735_v40 = vpop.permute.xlu0 %734  ;;  %v739_v48 = vpop.permute.xlu1 %738 }
 0x38d   : > { %v782_v41 = vpop.permute.xlu2 %781 }
 0x38e   : > { %v786_v43 = vsel %vm408_vm1, %v780_v23, %v782_v41 }
 0x38f   : > { %900 = vrot.lane.b32.xlu1 %v851_v44, %s1329_s13  ;;  %v854_v45 = vsel %vm436_vm3, %v786_v43, %v797_v42 }
 0x390   : > { %902 = vrot.lane.b32.xlu2 %v854_v45, %s1329_s13 }
 0x394   : > { %v784_v46 = vpop.permute.xlu0 %783  ;;  %v758_v63 = vpop.permute.xlu1 %757 }
 0x395   : > { %v726_v47 = vpop.permute.xlu2 %725  ;;  %v760_v2 = vsel %vm382_vm7, %v756_v25, %v758_v63  ;;  %v787_v3 = vsel %vm408_vm1, %v782_v41, %v784_v46 }
 0x396   : > { %v731_v53 = vsel %vm360_vm6, %v724_v31, %v726_v47  ;;  %v732_v54 = vsel %vm360_vm6, %v726_v47, %v728_v39 }
 0x39c   : > { %v771_v57 = vpop.permute.xlu0 %770  ;;  %v715_v13 = vpop.permute.xlu1 %714 }
 0x39d   : > { %v737_v52 = vpop.permute.xlu2 %736  ;;  %v775_v0 = vsel %vm396_vm4, %v769_v27, %v771_v57 }
 0x39e   : > { %v742_v55 = vsel %vm372_vm5, %v735_v40, %v737_v52  ;;  %v743_v56 = vsel %vm372_vm5, %v737_v52, %v739_v48  ;;  %v842_v11 = vsel %vm436_vm3, %v760_v2, %v775_v0 }
 0x39f   : > { %v827_v58 = vsel %vm436_vm3, %v732_v54, %v743_v56  ;;  %v824_v60 = vsel %vm436_vm3, %v731_v53, %v742_v55 }
 0x3a0   : > { %884 = vrot.lane.b32.xlu0 %v827_v58, %s1329_s13  ;;  %882 = vrot.lane.b32.xlu1 %v824_v60, %s1329_s13  ;;  %v696_v58 = vld [vmem:[%s1837_s5] sm:$0xf] }
 0x3a4   : > { %v717_v6 = vpop.permute.xlu0 %716  ;;  %v730_v22 = vpop.permute.xlu1 %729 }
 0x3a5   : > { %v795_v1 = vpop.permute.xlu2 %794  ;;  %v721_v14 = vsel %vm348_vm8, %v715_v13, %v717_v6  ;;  %v733_v25 = vsel %vm360_vm6, %v728_v39, %v730_v22 }
 0x3a6   : > { %v798_v4 = vsel %vm420_vm2, %v793_v30, %v795_v1  ;;  %v815_v20 = vsel %vm436_vm3, %v1674_v15, %v721_v14 }
 0x3a7   : > { %v857_v5 = vsel %vm436_vm3, %v787_v3, %v798_v4 }
 0x3a8   : > { %904 = vrot.lane.b32.xlu2 %v857_v5, %s1329_s13  ;;  %894 = vrot.lane.b32.xlu1 %v842_v11, %s1329_s13 }
 0x3ac   : > { %v741_v21 = vpop.permute.xlu0 %740 }
 0x3ad   : > { %v713_v16 = vpop.permute.xlu2 %712  ;;  %v744_v23 = vsel %vm372_vm5, %v739_v48, %v741_v21 }
 0x3ae   : > { %v720_v18 = vsel %vm348_vm8, %v713_v16, %v715_v13  ;;  %v830_v15 = vsel %vm436_vm3, %v733_v25, %v744_v23 }
 0x3af   : > { %v812_v19 = vsel %vm436_vm3, %v1659_v9, %v720_v18  ;;  %v833_v9 = vsel %vm436_vm3, %v730_v22, %v741_v21 }
 0x3b0   : > { %874 = vrot.lane.b32.xlu0 %v812_v19, %s1329_s13  ;;  %876 = vrot.lane.b32.xlu2 %v815_v20, %s1329_s13 }
 0x3b5   : > { %v773_v7 = vpop.permute.xlu2 %772 }
 0x3b6   : > { %v776_v24 = vsel %vm396_vm4, %v771_v57, %v773_v7 }
 0x3b7   : > { %v845_v26 = vsel %vm436_vm3, %v758_v63, %v776_v24 }
 0x3b8   : > { %896 = vrot.lane.b32.xlu1 %v845_v26, %s1329_s13  ;;  %888 = vrot.lane.b32.xlu2 %v833_v9, %s1329_s13 }
 0x3b9   : > { %886 = vrot.lane.b32.xlu0 %v830_v15, %s1329_s13 }
 0x3bd   : > { %v719_v10 = vpop.permute.xlu2 %718 }
 0x3be   : > { %v722_v27 = vsel %vm348_vm8, %v717_v6, %v719_v10  ;;  %v821_v28 = vsel %vm436_vm3, %v1680_v17, %v719_v10 }
 0x3bf   : > { %v818_v12 = vsel %vm436_vm3, %v1657_v8, %v722_v27 }
 0x3c0   : > { %878 = vrot.lane.b32.xlu1 %v818_v12, %s1329_s13 }
 0x3c1   : > { %880 = vrot.lane.b32.xlu0 %v821_v28, %s1329_s13 }
 0x3c8   : > { %v907_v29 = vpop.permute.xlu1 %906  ;;  %v899_v33 = vpop.permute.xlu2 %898 }
 0x3d1   : > { %v909_v30 = vpop.permute.xlu0 %908 }
 0x3d2   : > { %v926_v31 = vsel %vm541_vm9, %v907_v29, %v909_v30 }
 0x3d3   : > { %v945_v32 = vsel %vm436_vm3, %v926_v31, 0 }
 0x3d4   : > { %956 = vmatpush.bf16.msra.mxu3 %v945_v32 }
 0x3d8   : > { %v913_v34 = vpop.permute.xlu2 %912 }
 0x3e9   : > { %v911_v35 = vpop.permute.xlu0 %910 }
 0x3ea   : > { %v927_v36 = vsel %vm541_vm9, %v909_v30, %v911_v35  ;;  %v928_v17 = vsel %vm541_vm9, %v911_v35, %v913_v34  ;;  %v903_v39 = vpop.permute.xlu2 %902 }
 0x3eb   : > { %v948_v8 = vsel %vm436_vm3, %v927_v36, 0  ;;  %v951_v37 = vsel %vm436_vm3, %v928_v17, 0  ;;  %v992_v36 = vld [vmem:[%s1838_s6] sm:$0xff] }
 0x3ec   : > { %969 = vmatpush.bf16.msrb.mxu0 %v948_v8  ;;  %982 = vmatpush.bf16.msrb.mxu1 %v951_v37 }
 0x3f9   : > { %v891_v38 = vpop.permute.xlu1 %890 }
 0x3fa   : > { %v893_v44 = vpop.permute.xlu0 %892 }
 0x3fb   : > { %v920_v46 = vsel %vm541_vm9, %v891_v38, %v893_v44 }
 0x401   : > { %v901_v40 = vpop.permute.xlu1 %900 }
 0x402   : > { %v905_v41 = vpop.permute.xlu2 %904  ;;  %v923_v42 = vsel %vm541_vm9, %v899_v33, %v901_v40  ;;  %v924_v43 = vsel %vm541_vm9, %v901_v40, %v903_v39 }
 0x403   : > { %957 = vmatpush.bf16.msra.mxu3 %v923_v42  ;;  %970 = vmatpush.bf16.msrb.mxu0 %v924_v43  ;;  %v925_v45 = vsel %vm541_vm9, %v903_v39, %v905_v41  ;;  %v993_v39 = vld [vmem:[%s1839_s7] sm:$0xff] }
 0x404   : > { %983 = vmatpush.bf16.msrb.mxu1 %v925_v45 }
 0x407   : > { %958 = vmatpush.bf16.msra.mxu3 %v920_v46 }
 0x40a   : > { %v877_v55 = vpop.permute.xlu2 %876 }
 0x412   : > { %v883_v47 = vpop.permute.xlu1 %882  ;;  %v885_v48 = vpop.permute.xlu0 %884 }
 0x413   : > { %v917_v52 = vsel %vm541_vm9, %v883_v47, %v885_v48  ;;  %v889_v2 = vpop.permute.xlu2 %888 }
 0x414   : > { %959 = vmatpush.bf16.msra.mxu3 %v917_v52 }
 0x41a   : > { %v895_v53 = vpop.permute.xlu1 %894 }
 0x41b   : > { %v921_v54 = vsel %vm541_vm9, %v893_v44, %v895_v53 }
 0x41c   : > { %971 = vmatpush.bf16.msrb.mxu0 %v921_v54 }
 0x422   : > { %v875_v56 = vpop.permute.xlu0 %874 }
 0x423   : > { %v914_v57 = vsel %vm541_vm9, %v875_v56, %v877_v55 }
 0x424   : > { %960 = vmatpush.bf16.msra.mxu3 %v914_v57 }
 0x427   : > { %1150 = vmatmul.msk.bf16.vlgmr.msra.gmra.mxu3 %vm569_vm10, %v696_v58 }
 0x42a   : > { %v897_v60 = vpop.permute.xlu1 %896 }
 0x42b   : > { %v887_v63 = vpop.permute.xlu0 %886  ;;  %v922_v0 = vsel %vm541_vm9, %v895_v53, %v897_v60 }
 0x42c   : > { %v918_v1 = vsel %vm541_vm9, %v885_v48, %v887_v63  ;;  %984 = vmatpush.bf16.msrb.mxu1 %v922_v0  ;;  %v919_v3 = vsel %vm541_vm9, %v887_v63, %v889_v2 }
 0x42d   : > { %972 = vmatpush.bf16.msrb.mxu0 %v918_v1 }
 0x430   : > { %985 = vmatpush.bf16.msrb.mxu1 %v919_v3 }
 0x432   : > { %v879_v4 = vpop.permute.xlu1 %878 }
 0x433   : > { %v881_v5 = vpop.permute.xlu0 %880  ;;  %v915_v11 = vsel %vm541_vm9, %v877_v55, %v879_v4 }
 0x434   : > { %973 = vmatpush.bf16.msrb.mxu0 %v915_v11  ;;  %v916_v6 = vsel %vm541_vm9, %v879_v4, %v881_v5 }
 0x435   : > { %986 = vmatpush.bf16.msrb.mxu1 %v916_v6 }
 0x437   : > { %1151 = vmatmul.msk.bf16.vlgmr.msrb.gmra.mxu0 %vm569_vm10, %v696_v58 }
 0x438   : > { %1152 = vmatmul.msk.bf16.vlgmr.msrb.gmra.mxu1 %vm569_vm10, %v696_v58 }
 0x4aa   : > { %v962_v13 = vpop.f32.mrf.mxu3 }
 0x4ab   : > { %v994_v16 = vmul.f32 %v962_v13, %v1622_v61 }
 0x4ad   : > { %v1002_v22 = vmul.f32 %v994_v16, %v962_v13 }
 0x4b2   : > { %v964_v14 = vpop.f32.mrf.mxu3 }
 0x4b4   : > { %v975_v18 = vpop.f32.mrf.mxu0 }
 0x4b5   : > { %v995_v19 = vmul.f32 %v975_v18, %v1620_v59  ;;  %v988_v20 = vpop.f32.mrf.mxu1 }
 0x4b6   : > { %v996_v21 = vmul.f32 %v988_v20, %v1624_v62 }
 0x4b7   : > { %v1003_v23 = vmul.f32 %v995_v19, %v975_v18  ;;  %v997_v7 = vadd.f32 %v995_v19, %v994_v16 }
 0x4b8   : > { %v1004_v25 = vmul.f32 %v996_v21, %v988_v20 }
 0x4b9   : > { %v998_v24 = vadd.f32 %v997_v7, %v996_v21  ;;  %v1005_v26 = vadd.f32 %v1003_v23, %v1002_v22 }
 0x4bb   : > { %999 = vadd.xlane.f32.xlu2 %v998_v24  ;;  %v1006_v9 = vadd.f32 %v1005_v26, %v1004_v25 }
 0x4bc   : > { %v977_v15 = vpop.f32.mrf.mxu0 }
 0x4bd   : > { %v990_v10 = vpop.f32.mrf.mxu1  ;;  %1007 = vadd.xlane.f32.xlu1 %v1006_v9 }
 0x52e   : > { %v1000_v27 = vpop.xlane.xlu2 %999 }
 0x52f   : > { %v1001_v28 = vmul.f32 0.00390625, %v1000_v27 }
 0x530   : > { %v1008_v61 = vpop.xlane.xlu1 %1007 }
 0x531   : > { %v1010_v12 = vmul.f32 %v1001_v28, %v1001_v28  ;;  %v1009_v29 = vmul.f32 0.00390625, %v1008_v61 }
 0x533   : > { %v1011_v59 = vsub.f32 %v1009_v29, %v1010_v12 }
 0x535   : > { %v1012_v30 = vmax.f32 %v1011_v59, 0.0 }
 0x537   : > { %v1013_v31 = vadd.f32 1e-05, %v1012_v30 }
 0x539   : > { %1221 = vrsqrt.f32 %v1013_v31  ;;  %vm1020_vm1 = vweird.f32 %v1013_v31 }
 0x53f   : > { %v1222_v62 = vpop.eup %1221 }
 0x540   : > { %v1015_v32 = vmul.f32 %v1222_v62, %v1013_v31  ;;  %vm1021_vm0 = vweird.f32 %v1222_v62 }
 0x541   : > { %vm1022_vm2 = vmor %vm1020_vm1, %vm1021_vm0 }
 0x542   : > { %v1016_v33 = vmul.f32 %v1222_v62, %v1015_v32 }
 0x544   : > { %v1017_v34 = vmul.f32 0.5, %v1016_v33 }
 0x546   : > { %v1018_v35 = vsub.f32 1.5, %v1017_v34 }
 0x548   : > { %v1019_v17 = vmul.f32 %v1222_v62, %v1018_v35 }
 0x54a   : > { %v1023_v8 = vsel %vm1022_vm2, %v1222_v62, %v1019_v17 }
 0x54b   : > { %v1024_v37 = vmul.f32 %v1023_v8, %v992_v36 }
 0x54d   : > { %1029 = vperm.xlu0 %1218, %v1024_v37   ;;  %v1025_v38 = vmul.f32 %v1024_v37, %v1001_v28 }
 0x54f   : > { %v1026_v40 = vsub.f32 %v993_v39, %v1025_v38 }
 0x555   : > { %1037 = vperm.xlu0 %1218, %v1026_v40  }
 0x5bf   : > { %v1030_v41 = vpop.permute.xlu0 %1029 }
 0x5c0   : > { %v1032_v42 = vmul.f32 %v1030_v41, %v962_v13  ;;  %v1033_v43 = vmul.f32 %v1030_v41, %v975_v18  ;;  %v1034_v44 = vmul.f32 %v1030_v41, %v988_v20 }
 0x5c7   : > { %v1038_v45 = vpop.permute.xlu0 %1037 }
 0x5c8   : > { %v1040_v46 = vadd.f32 %v1038_v45, %v1032_v42  ;;  %v1041_v47 = vadd.f32 %v1038_v45, %v1033_v43  ;;  %v1042_v48 = vadd.f32 %v1038_v45, %v1034_v44 }
 0x5ca   : > { %v1043_v52 = vmul.f32 0.1, %v1040_v46  ;;  %v1044_v53 = vmul.f32 0.1, %v1041_v47  ;;  %v1045_v54 = vmul.f32 0.1, %v1042_v48 }
 0x5cc   : > { %v1046_v55 = vmax.f32 %v1040_v46, %v1043_v52  ;;  %v1047_v56 = vmax.f32 %v1041_v47, %v1044_v53  ;;  %v1048_v57 = vmax.f32 %v1042_v48, %v1045_v54 }
 0x5ce   : > { %v1049_v58 = vadd.f32 %v1046_v55, %v1636_v49  ;;  %v1050_v60 = vadd.f32 %v1047_v56, %v1639_v50  ;;  %v1051_v63 = vadd.f32 %v1048_v57, %v1642_v51 }
 0x5d0   : > { %1052 = vst [vmem:[%s323_s11] sm:$0xff] %v1049_v58 }
 0x5d1   : > { %1053 = vst [vmem:[%s323_s11 + $0x8] sm:$0xff] %v1050_v60 }
 0x5d2   : > { %1054 = vst [vmem:[%s323_s11 + $0x10] sm:$0xff] %v1051_v63 }
 0x5d3   : > { %1280 = shalt.err (!%p1277_p7)
}
 0x5d4   : > { %1163 = dma.vmem_to_hbm [thread:$0]  (%p1422_p11), %s1070_s14, 384, %s1072_s19, %s1056_s9  }
 0x5d5 PF: > { %s1083_s18 = sand.u32 1, %s1307_s27   ;;  %p1170_p8 = pnand %p1144_p9, %p1426_p12 }
 0x5d6   : > { %s1084_s10 = scalar_lea.sflag [#allocation5], %s1083_s18 }
 0x5d7   : > { %p1171_p10 = pneg %p1170_p8 }
 0x5d9   : > { %1302 = dma.done.wait (%p1171_p10), %s1084_s10, 384  }
 0x5da   : > { %1304 = vsyncadd (%p1171_p10), %s1084_s10, 4294966912  ;;  %s1851_s30 = sld [smem:[#allocation10_spill]]  ;;  %s1854_s27 = smov %s1311_s28 }
 0x5db   : > { %s1852_s12 = sld [smem:[#allocation9_spill]] }
 0x5dc   : > { %s1853_s29 = sld [smem:[#allocation11_spill]] }
 0x5e0   : > { %p21_p0 = scmp.ge.s32.totalorder %s1851_s30, 4  }
 0x5e1   : > { %s1855_s28 = smov %s1852_s12 }
 0x5e2   :  { %23 = sbr.rel (!%p21_p0) target bundleno = 5 (0x5), region = 97 }
 0x5e7   :  { %1090 = vsyncpa [#allocation4], 1 }
 0x5e8   :  { %1092 = vsyncpa [#allocation4 + $0x1], 1 }
 0x5e9   :  { %1093 = vsyncpa [#allocation5], 1 }
 0x5ea   :  { %1095 = vsyncpa [#allocation5 + $0x1], 1 }

</bundles_post_ra>
